<compile_context>
chip_gen: v5e
topology: v5e:2x2
jax: 0.10.0
libtpu: 0.0.40
codegen_flags: <defaults>
</compile_context>

<pallas_src>
import jax
import jax.numpy as jnp
from jax import lax
from jax.experimental import pallas as pl
from jax.experimental.pallas import tpu as pltpu

# (Cout, Cin, kh, kw, stride, pad) -- static encoder configuration.
LAYER_CFGS = (
    (64, 3, 5, 5, 2, 2),
    (32, 64, 3, 3, 2, 1),
    (16, 32, 3, 3, 2, 1),
    (4, 16, 3, 3, 2, 1),
)
CPAD = 128      # lane-dense output channel padding (last dim of the Pallas store)
KALIGN = 128    # reduction-dim alignment (128-granular works on v5e/v6e/v7x MXUs)


def _round_up(x, m):
    return (x + m - 1) // m * m


def _pick_tile_m(m):
    """16-aligned M tile, capped at 256, targeting >=2 grid steps when M allows."""
    half = _round_up(max(m // 2, 1), 16)
    return int(min(256, max(16, half)))


# ----------------------------------------------------------------------------
# Pallas kernel: one (TM, K)bf16 x (K, CPAD)bf16 tile -> relu(x @ w), f32 out.
# Bias is already folded into w through the ones-column of x.
# ----------------------------------------------------------------------------
def _matmul_relu_kernel(x_ref, w_ref, o_ref):
    acc = jnp.dot(x_ref[...], w_ref[...], preferred_element_type=jnp.float32)
    o_ref[...] = jnp.maximum(acc, 0.0).astype(o_ref.dtype)


def matmul_relu(x_bf16, w_bf16, tm):
    """x: (Mp, K) bf16, w: (K, CPAD) bf16 -> (Mp, CPAD) f32 = relu(x @ w)."""
    Mp, K = x_bf16.shape
    Kw, Cp = w_bf16.shape
    assert K == Kw and Cp == CPAD
    assert Mp % tm == 0 and tm % 16 == 0 and K % KALIGN == 0

    # Double-buffered working set (bf16 inputs, f32 output) + headroom.
    vmem_bytes = 2 * (tm * K * 2 + K * Cp * 2 + tm * Cp * 4) + (2 << 20)
    vmem_limit = int(min(max(vmem_bytes, 4 << 20), 32 << 20))

    return pl.pallas_call(
        _matmul_relu_kernel,
        out_shape=jax.ShapeDtypeStruct((Mp, Cp), jnp.float32),
        grid=(Mp // tm,),
        in_specs=[
            pl.BlockSpec((tm, K), lambda i: (i, 0)),
            pl.BlockSpec((K, Cp), lambda i: (0, 0)),
        ],
        out_specs=pl.BlockSpec((tm, Cp), lambda i: (i, 0)),
        compiler_params=pltpu.CompilerParams(
            dimension_semantics=("parallel",),
            vmem_limit_bytes=vmem_limit,
        ),
    )(x_bf16, w_bf16)


# ----------------------------------------------------------------------------
# NHWC conv + ReLU: XLA-side im2col glue + Pallas fused matmul/bias/ReLU.
# The input `x` carries exactly Cin real channels; the output is sliced back to
# Cout real channels so the next layer's K stays minimal.
# ----------------------------------------------------------------------------
def conv2d_relu_nhwc(x, w, b, kh, kw, stride, pad):
    N, H, W, Cin = x.shape
    Cout, Cin_w, _, _ = w.shape
    assert Cin == Cin_w

    Ho = (H + 2 * pad - kh) // stride + 1
    Wo = (W + 2 * pad - kw) // stride + 1

    # im2col, channels-last: patch column order is (di, dj, channel).
    xp = jnp.pad(x, ((0, 0), (pad, pad), (pad, pad), (0, 0)))
    taps = [
        xp[:, di:di + stride * Ho:stride, dj:dj + stride * Wo:stride, :]
        for di in range(kh) for dj in range(kw)
    ]
    M = N * Ho * Wo
    K = kh * kw * Cin
    p = jnp.concatenate(taps, axis=-1).reshape(M, K)

    # Reserve one K-padding column for the folded bias (ones in real rows).
    Kp = _round_up(K + 1, KALIGN)
    p = jnp.concatenate([p, jnp.ones((M, 1), p.dtype)], axis=1)
    p = jnp.pad(p, ((0, 0), (0, Kp - K - 1)))

    # Weight matrix in matching (di, dj, channel) order; bias as row K;
    # zero-pad the rest of K and the output channels to CPAD (lane-dense store).
    w_mat = jnp.transpose(w, (2, 3, 1, 0)).reshape(K, Cout)      # (K, Cout)
    w_mat = jnp.concatenate([w_mat, b[None, :]], axis=0)          # bias row
    w_mat = jnp.pad(w_mat, ((0, Kp - K - 1), (0, CPAD - Cout)))

    # M tiling: >=2 grid steps when possible (pipelining + v7x dual-TC).
    tm = _pick_tile_m(M)
    Mp = _round_up(M, tm)
    if Mp > M:
        p = jnp.pad(p, ((0, Mp - M), (0, 0)))   # padded rows are all-zero
                                                # (incl. the ones-column) -> output 0

    # bf16 MXU operands, f32 accumulation inside the kernel.
    out = matmul_relu(p.astype(jnp.bfloat16), w_mat.astype(jnp.bfloat16), tm)

    out = out[:M].reshape(N, Ho, Wo, CPAD)
    return out[..., :Cout]      # carry only real channels into the next layer


# ----------------------------------------------------------------------------
# forward(): encoder only -- matches the PyTorch module's forward().
# ----------------------------------------------------------------------------
@jax.jit
def autoencoder_forward(x, params):
    """x: (N, 3, H, W) NCHW f32 -> (N, 4, H/16, W/16) NCHW f32."""
    x = jnp.transpose(x, (0, 2, 3, 1))                  # NCHW -> NHWC (once)
    for (w, b), (cout, cin, kh, kw, s, p) in zip(params, LAYER_CFGS):
        x = conv2d_relu_nhwc(x, w, b, kh, kw, s, p)
    return jnp.transpose(x, (0, 3, 1, 2))               # back to NCHW (once)


# ----------------------------------------------------------------------------
# Parameter init (PyTorch-style uniform(-1/sqrt(fan_in), +1/sqrt(fan_in))).
# ----------------------------------------------------------------------------
def init_conv_params(key, cout, cin, kh, kw):
    wk, bk = jax.random.split(key)
    fan_in = cin * kh * kw
    bound = 1.0 / (fan_in ** 0.5)
    w = jax.random.uniform(wk, (cout, cin, kh, kw), jnp.float32, -bound, bound)
    b = jax.random.uniform(bk, (cout,), jnp.float32, -bound, bound)
    return w, b


def make_encoder_params(key):
    keys = jax.random.split(key, len(LAYER_CFGS))
    return tuple(
        init_conv_params(k, co, ci, kh, kw)
        for k, (co, ci, kh, kw, s, p) in zip(keys, LAYER_CFGS)
    )


# ----------------------------------------------------------------------------
# References for validation.
# ----------------------------------------------------------------------------
def forward_ref_f32(x, params):
    """Pure f32 XLA reference (matches the PyTorch module bit-for-bit in math)."""
    for (w, b), (cout, cin, kh, kw, s, p) in zip(params, LAYER_CFGS):
        x = lax.conv_general_dilated(
            x, w, window_strides=(s, s), padding=((p, p), (p, p)),
            dimension_numbers=("NCHW", "OIHW", "NCHW"),
        )
        x = jnp.maximum(x + b[None, :, None, None], 0.0)
    return x


def forward_ref_bf16(x, params):
    """Reference matching the kernel numerics: bf16 operands, f32 accumulation."""
    for (w, b), (cout, cin, kh, kw, s, p) in zip(params, LAYER_CFGS):
        y = lax.conv_general_dilated(
            x.astype(jnp.bfloat16), w.astype(jnp.bfloat16),
            window_strides=(s, s), padding=((p, p), (p, p)),
            dimension_numbers=("NCHW", "OIHW", "NCHW"),
            preferred_element_type=jnp.float32,
        )
        bb = b.astype(jnp.bfloat16).astype(jnp.float32)
        x = jnp.maximum(y + bb[None, :, None, None], 0.0)
    return x


if __name__ == "__main__":
    key = jax.random.PRNGKey(0)
    pkey, xkey = jax.random.split(key)

    params = make_encoder_params(pkey)

    # Small NCHW input consistent with the module (3 input channels, 4 stride-2 convs).
    x = jax.random.normal(xkey, (2, 3, 32, 32), jnp.float32)

    out = jax.block_until_ready(autoencoder_forward(x, params))
    ref_bf = jax.block_until_ready(forward_ref_bf16(x, params))
    ref_f32 = jax.block_until_ready(forward_ref_f32(x, params))

    assert out.shape == (2, 4, 2, 2), out.shape

    err_bf = float(jnp.max(jnp.abs(out - ref_bf)))
    err_f32 = float(jnp.max(jnp.abs(out - ref_f32)))
    # Strict check against the numerics-matched (bf16-operand, f32-accum) reference.
    assert jnp.allclose(out, ref_bf, atol=2e-3, rtol=2e-3), (
        f"mismatch vs bf16-matched reference, max abs err={err_bf}")
    # Loose check against the full-f32 reference (bf16 operand rounding only).
    assert jnp.allclose(out, ref_f32, atol=5e-2, rtol=5e-2), (
        f"mismatch vs f32 reference, max abs err={err_f32}")

    print("KERNEL_OK")
</pallas_src>

<mosaic_0001>
module attributes {stable_mosaic.version = 11 : i64} {
  func.func @_matmul_relu_kernel(%arg0: i32, %arg1: memref<256x128xbf16, #tpu.memory_space<vmem>>, %arg2: memref<128x128xbf16, #tpu.memory_space<vmem>>, %arg3: memref<256x128xf32, #tpu.memory_space<vmem>>) attributes {dimension_semantics = [#tpu.dimension_semantics<parallel>], iteration_bounds = array<i64: 2>, scalar_prefetch = 0 : i64, scratch_operands = 0 : i64, tpu.core_type = #tpu.core_type<tc>, window_params = [{transform_indices = @transform_0, window_bounds = array<i64: 256, 128>}, {pipeline_mode = #tpu.pipeline_mode<synchronous>, transform_indices = @transform_1, window_bounds = array<i64: 128, 128>}, {transform_indices = @transform_2, window_bounds = array<i64: 256, 128>}]} {
    %c0 = arith.constant 0 : index
    %c0_0 = arith.constant 0 : index
    %0 = vector.load %arg1[%c0, %c0_0] : memref<256x128xbf16, #tpu.memory_space<vmem>>, vector<256x128xbf16>
    %c0_1 = arith.constant 0 : index
    %c0_2 = arith.constant 0 : index
    %1 = vector.load %arg2[%c0_1, %c0_2] : memref<128x128xbf16, #tpu.memory_space<vmem>>, vector<128x128xbf16>
    %cst = arith.constant dense<0.000000e+00> : vector<256x128xf32>
    %2 = tpu.matmul %0, %1, %cst {dimension_numbers = #tpu.dot_dimension_numbers<[1], [0], [0], [1], [0, 0, 1, 1], [], []>} : vector<256x128xbf16>, vector<128x128xbf16>, vector<256x128xf32> -> vector<256x128xf32>
    %cst_3 = arith.constant 0.000000e+00 : f32
    %3 = vector.broadcast %cst_3 : f32 to vector<256x128xf32>
    %4 = arith.maximumf %2, %3 : vector<256x128xf32>
    %c0_4 = arith.constant 0 : index
    %c0_5 = arith.constant 0 : index
    %5 = vector.load %arg3[%c0_4, %c0_5] : memref<256x128xf32, #tpu.memory_space<vmem>>, vector<256x128xf32>
    tpu.vector_store %arg3[%c0_4, %c0_5], %4 {strides = array<i32>} : memref<256x128xf32, #tpu.memory_space<vmem>>, vector<256x128xf32>,
    return
  }
  func.func @transform_0(%arg0: i32) -> (i32, i32) {
    %c0_i32 = arith.constant 0 : i32
    %c0_i32_0 = arith.constant 0 : i32
    return %arg0, %c0_i32 : i32, i32
  }
  func.func @transform_1(%arg0: i32) -> (i32, i32) {
    %c0_i32 = arith.constant 0 : i32
    %c0_i32_0 = arith.constant 0 : i32
    %c0_i32_1 = arith.constant 0 : i32
    return %c0_i32, %c0_i32_0 : i32, i32
  }
  func.func @transform_2(%arg0: i32) -> (i32, i32) {
    %c0_i32 = arith.constant 0 : i32
    %c0_i32_0 = arith.constant 0 : i32
    return %arg0, %c0_i32 : i32, i32
  }
}

module attributes {stable_mosaic.version = 11 : i64} {
  func.func @_matmul_relu_kernel(%arg0: i32, %arg1: memref<64x640xbf16, #tpu.memory_space<vmem>>, %arg2: memref<640x128xbf16, #tpu.memory_space<vmem>>, %arg3: memref<64x128xf32, #tpu.memory_space<vmem>>) attributes {dimension_semantics = [#tpu.dimension_semantics<parallel>], iteration_bounds = array<i64: 2>, scalar_prefetch = 0 : i64, scratch_operands = 0 : i64, tpu.core_type = #tpu.core_type<tc>, window_params = [{transform_indices = @transform_0, window_bounds = array<i64: 64, 640>}, {pipeline_mode = #tpu.pipeline_mode<synchronous>, transform_indices = @transform_1, window_bounds = array<i64: 640, 128>}, {transform_indices = @transform_2, window_bounds = array<i64: 64, 128>}]} {
    %c0 = arith.constant 0 : index
    %c0_0 = arith.constant 0 : index
    %0 = vector.load %arg1[%c0, %c0_0] : memref<64x640xbf16, #tpu.memory_space<vmem>>, vector<64x640xbf16>
    %c0_1 = arith.constant 0 : index
    %c0_2 = arith.constant 0 : index
    %1 = vector.load %arg2[%c0_1, %c0_2] : memref<640x128xbf16, #tpu.memory_space<vmem>>, vector<640x128xbf16>
    %cst = arith.constant dense<0.000000e+00> : vector<64x128xf32>
    %2 = tpu.matmul %0, %1, %cst {dimension_numbers = #tpu.dot_dimension_numbers<[1], [0], [0], [1], [0, 0, 1, 1], [], []>} : vector<64x640xbf16>, vector<640x128xbf16>, vector<64x128xf32> -> vector<64x128xf32>
    %cst_3 = arith.constant 0.000000e+00 : f32
    %3 = vector.broadcast %cst_3 : f32 to vector<64x128xf32>
    %4 = arith.maximumf %2, %3 : vector<64x128xf32>
    %c0_4 = arith.constant 0 : index
    %c0_5 = arith.constant 0 : index
    %5 = vector.load %arg3[%c0_4, %c0_5] : memref<64x128xf32, #tpu.memory_space<vmem>>, vector<64x128xf32>
    tpu.vector_store %arg3[%c0_4, %c0_5], %4 {strides = array<i32>} : memref<64x128xf32, #tpu.memory_space<vmem>>, vector<64x128xf32>,
    return
  }
  func.func @transform_0(%arg0: i32) -> (i32, i32) {
    %c0_i32 = arith.constant 0 : i32
    %c0_i32_0 = arith.constant 0 : i32
    return %arg0, %c0_i32 : i32, i32
  }
  func.func @transform_1(%arg0: i32) -> (i32, i32) {
    %c0_i32 = arith.constant 0 : i32
    %c0_i32_0 = arith.constant 0 : i32
    %c0_i32_1 = arith.constant 0 : i32
    return %c0_i32, %c0_i32_0 : i32, i32
  }
  func.func @transform_2(%arg0: i32) -> (i32, i32) {
    %c0_i32 = arith.constant 0 : i32
    %c0_i32_0 = arith.constant 0 : i32
    return %arg0, %c0_i32 : i32, i32
  }
}

module attributes {stable_mosaic.version = 11 : i64} {
  func.func @_matmul_relu_kernel(%arg0: i32, %arg1: memref<16x384xbf16, #tpu.memory_space<vmem>>, %arg2: memref<384x128xbf16, #tpu.memory_space<vmem>>, %arg3: memref<16x128xf32, #tpu.memory_space<vmem>>) attributes {dimension_semantics = [#tpu.dimension_semantics<parallel>], iteration_bounds = array<i64: 2>, scalar_prefetch = 0 : i64, scratch_operands = 0 : i64, tpu.core_type = #tpu.core_type<tc>, window_params = [{transform_indices = @transform_0, window_bounds = array<i64: 16, 384>}, {pipeline_mode = #tpu.pipeline_mode<synchronous>, transform_indices = @transform_1, window_bounds = array<i64: 384, 128>}, {transform_indices = @transform_2, window_bounds = array<i64: 16, 128>}]} {
    %c0 = arith.constant 0 : index
    %c0_0 = arith.constant 0 : index
    %0 = vector.load %arg1[%c0, %c0_0] : memref<16x384xbf16, #tpu.memory_space<vmem>>, vector<16x384xbf16>
    %c0_1 = arith.constant 0 : index
    %c0_2 = arith.constant 0 : index
    %1 = vector.load %arg2[%c0_1, %c0_2] : memref<384x128xbf16, #tpu.memory_space<vmem>>, vector<384x128xbf16>
    %cst = arith.constant dense<0.000000e+00> : vector<16x128xf32>
    %2 = tpu.matmul %0, %1, %cst {dimension_numbers = #tpu.dot_dimension_numbers<[1], [0], [0], [1], [0, 0, 1, 1], [], []>} : vector<16x384xbf16>, vector<384x128xbf16>, vector<16x128xf32> -> vector<16x128xf32>
    %cst_3 = arith.constant 0.000000e+00 : f32
    %3 = vector.broadcast %cst_3 : f32 to vector<16x128xf32>
    %4 = arith.maximumf %2, %3 : vector<16x128xf32>
    %c0_4 = arith.constant 0 : index
    %c0_5 = arith.constant 0 : index
    %5 = vector.load %arg3[%c0_4, %c0_5] : memref<16x128xf32, #tpu.memory_space<vmem>>, vector<16x128xf32>
    tpu.vector_store %arg3[%c0_4, %c0_5], %4 {strides = array<i32>} : memref<16x128xf32, #tpu.memory_space<vmem>>, vector<16x128xf32>,
    return
  }
  func.func @transform_0(%arg0: i32) -> (i32, i32) {
    %c0_i32 = arith.constant 0 : i32
    %c0_i32_0 = arith.constant 0 : i32
    return %arg0, %c0_i32 : i32, i32
  }
  func.func @transform_1(%arg0: i32) -> (i32, i32) {
    %c0_i32 = arith.constant 0 : i32
    %c0_i32_0 = arith.constant 0 : i32
    %c0_i32_1 = arith.constant 0 : i32
    return %c0_i32, %c0_i32_0 : i32, i32
  }
  func.func @transform_2(%arg0: i32) -> (i32, i32) {
    %c0_i32 = arith.constant 0 : i32
    %c0_i32_0 = arith.constant 0 : i32
    return %arg0, %c0_i32 : i32, i32
  }
}

module attributes {stable_mosaic.version = 11 : i64} {
  func.func @_matmul_relu_kernel(%arg0: i32, %arg1: memref<16x256xbf16, #tpu.memory_space<vmem>>, %arg2: memref<256x128xbf16, #tpu.memory_space<vmem>>, %arg3: memref<16x128xf32, #tpu.memory_space<vmem>>) attributes {dimension_semantics = [#tpu.dimension_semantics<parallel>], iteration_bounds = array<i64: 1>, scalar_prefetch = 0 : i64, scratch_operands = 0 : i64, tpu.core_type = #tpu.core_type<tc>, window_params = [{transform_indices = @transform_0, window_bounds = array<i64: 16, 256>}, {pipeline_mode = #tpu.pipeline_mode<synchronous>, transform_indices = @transform_1, window_bounds = array<i64: 256, 128>}, {transform_indices = @transform_2, window_bounds = array<i64: 16, 128>}]} {
    %c0 = arith.constant 0 : index
    %c0_0 = arith.constant 0 : index
    %0 = vector.load %arg1[%c0, %c0_0] : memref<16x256xbf16, #tpu.memory_space<vmem>>, vector<16x256xbf16>
    %c0_1 = arith.constant 0 : index
    %c0_2 = arith.constant 0 : index
    %1 = vector.load %arg2[%c0_1, %c0_2] : memref<256x128xbf16, #tpu.memory_space<vmem>>, vector<256x128xbf16>
    %cst = arith.constant dense<0.000000e+00> : vector<16x128xf32>
    %2 = tpu.matmul %0, %1, %cst {dimension_numbers = #tpu.dot_dimension_numbers<[1], [0], [0], [1], [0, 0, 1, 1], [], []>} : vector<16x256xbf16>, vector<256x128xbf16>, vector<16x128xf32> -> vector<16x128xf32>
    %cst_3 = arith.constant 0.000000e+00 : f32
    %3 = vector.broadcast %cst_3 : f32 to vector<16x128xf32>
    %4 = arith.maximumf %2, %3 : vector<16x128xf32>
    %c0_4 = arith.constant 0 : index
    %c0_5 = arith.constant 0 : index
    %5 = vector.load %arg3[%c0_4, %c0_5] : memref<16x128xf32, #tpu.memory_space<vmem>>, vector<16x128xf32>
    tpu.vector_store %arg3[%c0_4, %c0_5], %4 {strides = array<i32>} : memref<16x128xf32, #tpu.memory_space<vmem>>, vector<16x128xf32>,
    return
  }
  func.func @transform_0(%arg0: i32) -> (i32, i32) {
    %c0_i32 = arith.constant 0 : i32
    %c0_i32_0 = arith.constant 0 : i32
    return %arg0, %c0_i32 : i32, i32
  }
  func.func @transform_1(%arg0: i32) -> (i32, i32) {
    %c0_i32 = arith.constant 0 : i32
    %c0_i32_0 = arith.constant 0 : i32
    %c0_i32_1 = arith.constant 0 : i32
    return %c0_i32, %c0_i32_0 : i32, i32
  }
  func.func @transform_2(%arg0: i32) -> (i32, i32) {
    %c0_i32 = arith.constant 0 : i32
    %c0_i32_0 = arith.constant 0 : i32
    return %arg0, %c0_i32 : i32, i32
  }
}

</mosaic_0001>

<bundles_post_ra>
// kernel: autoencoder_forward.4
= control target key start
LH: loop header
LB: loop body
LE: loop exit
PB: predicated region body
PF: predicated region fallthrough
CT: control target
= control target key end

     0   :  { %s734_s9 = smov 0   ;;  %s831_s0 = inlined_call_operand.vmem [shape: bf16[512,128], index: 0, kind: input, shape index: {}]   ;;  %s832_s1 = inlined_call_operand.vmem [shape: bf16[128,128], index: 1, kind: input, shape index: {}]   ;;  %s833_s2 = inlined_call_operand.vmem [shape: f32[512,128], index: 2, kind: output, shape index: {}]  }
   0x1 LB: > { %s548_s10 = sadd.s32 4294967295, %s717_s9   ;;  %p552_p0 = scmp.ge.s32.totalorder %s717_s9, 1  ;;  %s717_s9 = sphi %s734_s9, %s12_s9  }
   0x2   : > { %p113_p1 = scmp.lt.s32.totalorder %s717_s9, 3 }
   0x4   : > { %p114_p2 = pnand %p552_p0, %p113_p1 }
   0x5   : > { %s553_s19 = sshll.u32 (!%p114_p2), %s548_s10, 5 }
   0x6   : > { %117 = sbr.rel (%p114_p2) target bundleno = 236 (0xec), region = 28  ;;  %p136_p3 = scmp.lt.s32.totalorder (!%p114_p2), %s553_s19, 63 }
   0xb   : > { %v678_v0 = vld [vmem:[%s832_s1 + $0x38] sm:$0xff]  ;;  %v677_v1 = vld [vmem:[%s832_s1 + $0x30] sm:$0xff]  ;;  %v676_v2 = vld [vmem:[%s832_s1 + $0x28] sm:$0xff]  ;;  %s835_s19 = smov (!%p136_p3, %s553_s19), 63 }
   0xc   : > { %339 = vmatpush.bf16.msra.mxu0 %v678_v0  ;;  %679 = vmatpush.bf16.msra.mxu1 %v678_v0  ;;  %v675_v3 = vld [vmem:[%s832_s1 + $0x20] sm:$0xff]  ;;  %v674_v4 = vld [vmem:[%s832_s1 + $0x18] sm:$0xff]  ;;  %v673_v5 = vld [vmem:[%s832_s1 + $0x10] sm:$0xff]  ;;  %s554_s26 = sshll.u32 %s835_s19, 2  ;;  %s556_s4 = sshll.u32 %s835_s19, 3 }
   0xd   : > { %680 = vmatpush.bf16.msra.mxu2 %v678_v0  ;;  %681 = vmatpush.bf16.msra.mxu3 %v678_v0  ;;  %v672_v6 = vld [vmem:[%s832_s1 + $0x8] sm:$0xff]  ;;  %v671_v7 = vld [vmem:[%s832_s1] sm:$0xff]  ;;  %s772_s3 = scalar_lea.vmem %s831_s0, %s554_s26  ;;  %s794_s7 = scalar_lea.vmem %s833_s2, %s556_s4 }
   0xe   : > { %v655_v8 = vld [vmem:[%s772_s3] sm:$0xff]  ;;  %v656_v12 = vld [vmem:[%s772_s3 + $0x8] sm:$0xff]  ;;  %v657_v16 = vld [vmem:[%s772_s3 + $0x10] sm:$0xff] }
   0xf   : > { %v659_v9 = vld [vmem:[%s772_s3 + $0x20] sm:$0xff]  ;;  %v660_v13 = vld [vmem:[%s772_s3 + $0x28] sm:$0xff]  ;;  %v661_v17 = vld [vmem:[%s772_s3 + $0x30] sm:$0xff] }
  0x10   : > { %340 = vmatpush.bf16.msra.mxu0 %v677_v1  ;;  %682 = vmatpush.bf16.msra.mxu1 %v677_v1  ;;  %v663_v10 = vld [vmem:[%s772_s3 + $0x40] sm:$0xff]  ;;  %v664_v14 = vld [vmem:[%s772_s3 + $0x48] sm:$0xff]  ;;  %v665_v18 = vld [vmem:[%s772_s3 + $0x50] sm:$0xff] }
  0x11   : > { %683 = vmatpush.bf16.msra.mxu2 %v677_v1  ;;  %684 = vmatpush.bf16.msra.mxu3 %v677_v1  ;;  %v667_v11 = vld [vmem:[%s772_s3 + $0x60] sm:$0xff]  ;;  %v668_v15 = vld [vmem:[%s772_s3 + $0x68] sm:$0xff]  ;;  %v669_v19 = vld [vmem:[%s772_s3 + $0x70] sm:$0xff] }
  0x12   : > { %v658_v20 = vld [vmem:[%s772_s3 + $0x18] sm:$0xff] }
  0x13   : > { %v662_v21 = vld [vmem:[%s772_s3 + $0x38] sm:$0xff] }
  0x14   : > { %341 = vmatpush.bf16.msra.mxu0 %v676_v2  ;;  %685 = vmatpush.bf16.msra.mxu1 %v676_v2  ;;  %v666_v22 = vld [vmem:[%s772_s3 + $0x58] sm:$0xff] }
  0x15   : > { %686 = vmatpush.bf16.msra.mxu2 %v676_v2  ;;  %687 = vmatpush.bf16.msra.mxu3 %v676_v2  ;;  %v670_v23 = vld [vmem:[%s772_s3 + $0x78] sm:$0xff] }
  0x18   : > { %342 = vmatpush.bf16.msra.mxu0 %v675_v3  ;;  %688 = vmatpush.bf16.msra.mxu1 %v675_v3 }
  0x19   : > { %689 = vmatpush.bf16.msra.mxu2 %v675_v3  ;;  %690 = vmatpush.bf16.msra.mxu3 %v675_v3 }
  0x1c   : > { %343 = vmatpush.bf16.msra.mxu0 %v674_v4  ;;  %691 = vmatpush.bf16.msra.mxu1 %v674_v4 }
  0x1d   : > { %692 = vmatpush.bf16.msra.mxu2 %v674_v4  ;;  %693 = vmatpush.bf16.msra.mxu3 %v674_v4 }
  0x20   : > { %344 = vmatpush.bf16.msra.mxu0 %v673_v5  ;;  %694 = vmatpush.bf16.msra.mxu1 %v673_v5 }
  0x21   : > { %695 = vmatpush.bf16.msra.mxu2 %v673_v5  ;;  %696 = vmatpush.bf16.msra.mxu3 %v673_v5 }
  0x24   : > { %345 = vmatpush.bf16.msra.mxu0 %v672_v6  ;;  %697 = vmatpush.bf16.msra.mxu1 %v672_v6 }
  0x25   : > { %698 = vmatpush.bf16.msra.mxu2 %v672_v6  ;;  %699 = vmatpush.bf16.msra.mxu3 %v672_v6 }
  0x28   : > { %346 = vmatpush.bf16.msra.mxu0 %v671_v7  ;;  %700 = vmatpush.bf16.msra.mxu1 %v671_v7 }
  0x29   : > { %701 = vmatpush.bf16.msra.mxu2 %v671_v7  ;;  %702 = vmatpush.bf16.msra.mxu3 %v671_v7 }
  0x2b   : > { %347 = vmatmul.bf16.vlgmr.msra.gmra.mxu0 %v655_v8  ;;  %367 = vmatmul.bf16.vlgmr.msra.gmra.mxu1 %v659_v9 }
  0x2c   : > { %387 = vmatmul.bf16.vlgmr.msra.gmra.mxu2 %v663_v10  ;;  %407 = vmatmul.bf16.vlgmr.msra.gmra.mxu3 %v667_v11 }
  0x3b   : > { %352 = vmatmul.bf16.gmra.mxu0 %v656_v12  ;;  %372 = vmatmul.bf16.gmra.mxu1 %v660_v13 }
  0x3c   : > { %392 = vmatmul.bf16.gmra.mxu2 %v664_v14  ;;  %412 = vmatmul.bf16.gmra.mxu3 %v668_v15 }
  0x4b   : > { %357 = vmatmul.bf16.gmra.mxu0 %v657_v16  ;;  %377 = vmatmul.bf16.gmra.mxu1 %v661_v17 }
  0x4c   : > { %397 = vmatmul.bf16.gmra.mxu2 %v665_v18  ;;  %417 = vmatmul.bf16.gmra.mxu3 %v669_v19 }
  0x5b   : > { %362 = vmatmul.bf16.gmra.mxu0 %v658_v20  ;;  %382 = vmatmul.bf16.gmra.mxu1 %v662_v21 }
  0x5c   : > { %402 = vmatmul.bf16.gmra.mxu2 %v666_v22  ;;  %422 = vmatmul.bf16.gmra.mxu3 %v670_v23 }
  0xa8   : > { %v348_v24 = vpop.f32.mrf.mxu0  ;;  %v368_v25 = vpop.f32.mrf.mxu1 }
  0xa9   : > { %v428_v26 = vmax.f32 %v348_v24, 0.0  ;;  %v436_v27 = vmax.f32 %v368_v25, 0.0 }
  0xab   : > { %460 = vst [vmem:[%s794_s7] sm:$0xff] %v428_v26 }
  0xac   : > { %468 = vst [vmem:[%s794_s7 + $0x40] sm:$0xff] %v436_v27 }
  0xaf   : > { %v388_v28 = vpop.f32.mrf.mxu2  ;;  %v408_v29 = vpop.f32.mrf.mxu3 }
  0xb0   : > { %v444_v30 = vmax.f32 %v388_v28, 0.0  ;;  %v452_v31 = vmax.f32 %v408_v29, 0.0  ;;  %v350_v32 = vpop.f32.mrf.mxu0  ;;  %v370_v33 = vpop.f32.mrf.mxu1 }
  0xb1   : > { %v429_v34 = vmax.f32 %v350_v32, 0.0  ;;  %v437_v35 = vmax.f32 %v370_v33, 0.0 }
  0xb2   : > { %476 = vst [vmem:[%s794_s7 + $0x80] sm:$0xff] %v444_v30 }
  0xb3   : > { %484 = vst [vmem:[%s794_s7 + $0xc0] sm:$0xff] %v452_v31 }
  0xb4   : > { %461 = vst [vmem:[%s794_s7 + $0x8] sm:$0xff] %v429_v34 }
  0xb5   : > { %469 = vst [vmem:[%s794_s7 + $0x48] sm:$0xff] %v437_v35 }
  0xb7   : > { %v390_v36 = vpop.f32.mrf.mxu2  ;;  %v410_v37 = vpop.f32.mrf.mxu3 }
  0xb8   : > { %v445_v38 = vmax.f32 %v390_v36, 0.0  ;;  %v453_v39 = vmax.f32 %v410_v37, 0.0  ;;  %v353_v40 = vpop.f32.mrf.mxu0  ;;  %v373_v41 = vpop.f32.mrf.mxu1 }
  0xb9   : > { %v430_v42 = vmax.f32 %v353_v40, 0.0  ;;  %v438_v43 = vmax.f32 %v373_v41, 0.0 }
  0xba   : > { %477 = vst [vmem:[%s794_s7 + $0x88] sm:$0xff] %v445_v38 }
  0xbb   : > { %485 = vst [vmem:[%s794_s7 + $0xc8] sm:$0xff] %v453_v39 }
  0xbc   : > { %462 = vst [vmem:[%s794_s7 + $0x10] sm:$0xff] %v430_v42 }
  0xbd   : > { %470 = vst [vmem:[%s794_s7 + $0x50] sm:$0xff] %v438_v43 }
  0xbf   : > { %v393_v44 = vpop.f32.mrf.mxu2  ;;  %v413_v45 = vpop.f32.mrf.mxu3 }
  0xc0   : > { %v446_v46 = vmax.f32 %v393_v44, 0.0  ;;  %v454_v47 = vmax.f32 %v413_v45, 0.0  ;;  %v355_v48 = vpop.f32.mrf.mxu0  ;;  %v375_v49 = vpop.f32.mrf.mxu1 }
  0xc1   : > { %v431_v50 = vmax.f32 %v355_v48, 0.0  ;;  %v439_v51 = vmax.f32 %v375_v49, 0.0 }
  0xc2   : > { %478 = vst [vmem:[%s794_s7 + $0x90] sm:$0xff] %v446_v46 }
  0xc3   : > { %486 = vst [vmem:[%s794_s7 + $0xd0] sm:$0xff] %v454_v47 }
  0xc4   : > { %463 = vst [vmem:[%s794_s7 + $0x18] sm:$0xff] %v431_v50 }
  0xc5   : > { %471 = vst [vmem:[%s794_s7 + $0x58] sm:$0xff] %v439_v51 }
  0xc7   : > { %v395_v52 = vpop.f32.mrf.mxu2  ;;  %v415_v53 = vpop.f32.mrf.mxu3 }
  0xc8   : > { %v447_v54 = vmax.f32 %v395_v52, 0.0  ;;  %v455_v55 = vmax.f32 %v415_v53, 0.0  ;;  %v358_v56 = vpop.f32.mrf.mxu0  ;;  %v378_v57 = vpop.f32.mrf.mxu1 }
  0xc9   : > { %v432_v58 = vmax.f32 %v358_v56, 0.0  ;;  %v440_v59 = vmax.f32 %v378_v57, 0.0 }
  0xca   : > { %479 = vst [vmem:[%s794_s7 + $0x98] sm:$0xff] %v447_v54 }
  0xcb   : > { %487 = vst [vmem:[%s794_s7 + $0xd8] sm:$0xff] %v455_v55 }
  0xcc   : > { %464 = vst [vmem:[%s794_s7 + $0x20] sm:$0xff] %v432_v58 }
  0xcd   : > { %472 = vst [vmem:[%s794_s7 + $0x60] sm:$0xff] %v440_v59 }
  0xcf   : > { %v398_v60 = vpop.f32.mrf.mxu2  ;;  %v418_v61 = vpop.f32.mrf.mxu3 }
  0xd0   : > { %v448_v62 = vmax.f32 %v398_v60, 0.0  ;;  %v456_v63 = vmax.f32 %v418_v61, 0.0  ;;  %v360_v0 = vpop.f32.mrf.mxu0  ;;  %v380_v1 = vpop.f32.mrf.mxu1 }
  0xd1   : > { %v433_v2 = vmax.f32 %v360_v0, 0.0  ;;  %v441_v3 = vmax.f32 %v380_v1, 0.0 }
  0xd2   : > { %480 = vst [vmem:[%s794_s7 + $0xa0] sm:$0xff] %v448_v62 }
  0xd3   : > { %488 = vst [vmem:[%s794_s7 + $0xe0] sm:$0xff] %v456_v63 }
  0xd4   : > { %465 = vst [vmem:[%s794_s7 + $0x28] sm:$0xff] %v433_v2 }
  0xd5   : > { %473 = vst [vmem:[%s794_s7 + $0x68] sm:$0xff] %v441_v3 }
  0xd7   : > { %v400_v4 = vpop.f32.mrf.mxu2  ;;  %v420_v5 = vpop.f32.mrf.mxu3 }
  0xd8   : > { %v449_v6 = vmax.f32 %v400_v4, 0.0  ;;  %v457_v7 = vmax.f32 %v420_v5, 0.0  ;;  %v363_v8 = vpop.f32.mrf.mxu0  ;;  %v383_v9 = vpop.f32.mrf.mxu1 }
  0xd9   : > { %v434_v10 = vmax.f32 %v363_v8, 0.0  ;;  %v442_v11 = vmax.f32 %v383_v9, 0.0 }
  0xda   : > { %481 = vst [vmem:[%s794_s7 + $0xa8] sm:$0xff] %v449_v6 }
  0xdb   : > { %489 = vst [vmem:[%s794_s7 + $0xe8] sm:$0xff] %v457_v7 }
  0xdc   : > { %466 = vst [vmem:[%s794_s7 + $0x30] sm:$0xff] %v434_v10 }
  0xdd   : > { %474 = vst [vmem:[%s794_s7 + $0x70] sm:$0xff] %v442_v11 }
  0xdf   : > { %v403_v12 = vpop.f32.mrf.mxu2  ;;  %v423_v13 = vpop.f32.mrf.mxu3 }
  0xe0   : > { %v450_v14 = vmax.f32 %v403_v12, 0.0  ;;  %v458_v15 = vmax.f32 %v423_v13, 0.0  ;;  %v365_v16 = vpop.f32.mrf.mxu0  ;;  %v385_v17 = vpop.f32.mrf.mxu1 }
  0xe1   : > { %v435_v18 = vmax.f32 %v365_v16, 0.0  ;;  %v443_v19 = vmax.f32 %v385_v17, 0.0 }
  0xe2   : > { %482 = vst [vmem:[%s794_s7 + $0xb0] sm:$0xff] %v450_v14 }
  0xe3   : > { %490 = vst [vmem:[%s794_s7 + $0xf0] sm:$0xff] %v458_v15 }
  0xe4   : > { %467 = vst [vmem:[%s794_s7 + $0x38] sm:$0xff] %v435_v18 }
  0xe5   : > { %475 = vst [vmem:[%s794_s7 + $0x78] sm:$0xff] %v443_v19 }
  0xe7   : > { %v405_v20 = vpop.f32.mrf.mxu2  ;;  %v425_v21 = vpop.f32.mrf.mxu3 }
  0xe8   : > { %v451_v22 = vmax.f32 %v405_v20, 0.0  ;;  %v459_v23 = vmax.f32 %v425_v21, 0.0 }
  0xea   : > { %483 = vst [vmem:[%s794_s7 + $0xb8] sm:$0xff] %v451_v22 }
  0xeb   : > { %491 = vst [vmem:[%s794_s7 + $0xf8] sm:$0xff] %v459_v23 }
  0xec PF: > { %s12_s9 = sadd.s32 1, %s717_s9  }
  0xed   : > { %p9_p4 = scmp.ge.s32.totalorder %s12_s9, 4  }
  0xef   :  { %11 = sbr.rel (!%p9_p4) target bundleno = 1 (0x1), region = 58 }

// kernel: autoencoder_forward.5
= control target key start
LH: loop header
LB: loop body
LE: loop exit
PB: predicated region body
PF: predicated region fallthrough
CT: control target
= control target key end

     0   :  { %s1174_s9 = smov 0   ;;  %s1373_s0 = inlined_call_operand.vmem [shape: bf16[128,640], index: 0, kind: input, shape index: {}]   ;;  %s1374_s1 = inlined_call_operand.vmem [shape: bf16[640,128], index: 1, kind: input, shape index: {}]   ;;  %s1375_s2 = inlined_call_operand.vmem [shape: f32[128,128], index: 2, kind: output, shape index: {}]  }
   0x1 LB: > { %s815_s10 = sadd.s32 4294967295, %s1157_s9   ;;  %p819_p0 = scmp.ge.s32.totalorder %s1157_s9, 1  ;;  %s1157_s9 = sphi %s1174_s9, %s12_s9  }
   0x2   : > { %p114_p1 = scmp.lt.s32.totalorder %s1157_s9, 3 }
   0x4   : > { %p115_p2 = pnand %p819_p0, %p114_p1 }
   0x5   : > { %s820_s27 = sshll.u32 (!%p115_p2), %s815_s10, 3 }
   0x6   : > { %118 = sbr.rel (%p115_p2) target bundleno = 268 (0x10c), region = 28  ;;  %p138_p3 = scmp.lt.s32.totalorder (!%p115_p2), %s820_s27, 15 }
   0xb   : > { %v1093_v0 = vld [vmem:[%s1374_s1 + $0x38] sm:$0xff]  ;;  %v1092_v2 = vld [vmem:[%s1374_s1 + $0x30] sm:$0xff]  ;;  %v1091_v6 = vld [vmem:[%s1374_s1 + $0x28] sm:$0xff]  ;;  %s1377_s27 = smov (!%p138_p3, %s820_s27), 15 }
   0xc   : > { %v1109_v1 = vld [vmem:[%s1374_s1 + $0xb8] sm:$0xff]  ;;  %1126 = vmatpush.bf16.msra.mxu1 %v1093_v0  ;;  %598 = vmatpush.bf16.msra.mxu0 %v1093_v0  ;;  %v1108_v3 = vld [vmem:[%s1374_s1 + $0xb0] sm:$0xff]  ;;  %v1107_v7 = vld [vmem:[%s1374_s1 + $0xa8] sm:$0xff]  ;;  %s1142_s17 = smul.u32 20, %s1377_s27 }
   0xd   : > { %656 = vmatpush.bf16.msra.mxu2 %v1109_v1  ;;  %v1117_v4 = vld [vmem:[%s1374_s1 + $0xf8] sm:$0xff]  ;;  %v1116_v5 = vld [vmem:[%s1374_s1 + $0xf0] sm:$0xff]  ;;  %v1115_v8 = vld [vmem:[%s1374_s1 + $0xe8] sm:$0xff] }
   0xe   : > { %685 = vmatpush.bf16.msra.mxu3 %v1117_v4  ;;  %v1090_v9 = vld [vmem:[%s1374_s1 + $0x20] sm:$0xff]  ;;  %v1089_v12 = vld [vmem:[%s1374_s1 + $0x18] sm:$0xff]  ;;  %v1088_v15 = vld [vmem:[%s1374_s1 + $0x10] sm:$0xff]  ;;  %s1245_s26 = scalar_lea.vmem %s1373_s0, %s1142_s17 }
   0xf   : > { %v1106_v10 = vld [vmem:[%s1374_s1 + $0xa0] sm:$0xff]  ;;  %v1105_v13 = vld [vmem:[%s1374_s1 + $0x98] sm:$0xff]  ;;  %v1104_v16 = vld [vmem:[%s1374_s1 + $0x90] sm:$0xff] }
  0x10   : > { %1127 = vmatpush.bf16.msra.mxu1 %v1092_v2  ;;  %599 = vmatpush.bf16.msra.mxu0 %v1092_v2  ;;  %v1114_v11 = vld [vmem:[%s1374_s1 + $0xe0] sm:$0xff]  ;;  %v1113_v14 = vld [vmem:[%s1374_s1 + $0xd8] sm:$0xff]  ;;  %v1112_v17 = vld [vmem:[%s1374_s1 + $0xd0] sm:$0xff] }
  0x11   : > { %657 = vmatpush.bf16.msra.mxu2 %v1108_v3  ;;  %v1087_v18 = vld [vmem:[%s1374_s1 + $0x8] sm:$0xff]  ;;  %v1086_v20 = vld [vmem:[%s1374_s1] sm:$0xff]  ;;  %v866_v21 = vld [vmem:[%s1245_s26 + $0x50] sm:$0xf] }
  0x12   : > { %686 = vmatpush.bf16.msra.mxu3 %v1116_v5  ;;  %v1103_v19 = vld [vmem:[%s1374_s1 + $0x88] sm:$0xff]  ;;  %v1101_v22 = vld [vmem:[%s1374_s1 + $0x78] sm:$0xff]  ;;  %v1078_v24 = vld [vmem:[%s1245_s26 + $0x60] sm:$0xf0] }
  0x13   : > { %v1111_v23 = vld [vmem:[%s1374_s1 + $0xc8] sm:$0xff]  ;;  %v826_v25 = vld [vmem:[%s1245_s26] sm:$0xf]  ;;  %v1068_v26 = vld [vmem:[%s1245_s26 + $0x10] sm:$0xf0]  ;;  %v867_v31 = vor.u32 %v1078_v24, %v866_v21 }
  0x14   : > { %1128 = vmatpush.bf16.msra.mxu1 %v1091_v6  ;;  %600 = vmatpush.bf16.msra.mxu0 %v1091_v6  ;;  %v1102_v27 = vld [vmem:[%s1374_s1 + $0x80] sm:$0xff]  ;;  %v834_v28 = vld [vmem:[%s1245_s26 + $0x8] sm:$0xf]  ;;  %v1069_v29 = vld [vmem:[%s1245_s26 + $0x18] sm:$0xf0]  ;;  %v827_v32 = vor.u32 %v1068_v26, %v826_v25 }
  0x15   : > { %658 = vmatpush.bf16.msra.mxu2 %v1107_v7  ;;  %v1125_v30 = vld [vmem:[%s1374_s1 + $0x138] sm:$0xff]  ;;  %v835_v33 = vor.u32 %v1069_v29, %v834_v28  ;;  %v1110_v34 = vld [vmem:[%s1374_s1 + $0xc0] sm:$0xff]  ;;  %v1067_v35 = vld [vmem:[%s1245_s26 + $0xc] sm:$0xf] }
  0x16   : > { %687 = vmatpush.bf16.msra.mxu3 %v1115_v8  ;;  %v836_v36 = vld [vmem:[%s1245_s26 + $0x1c] sm:$0xf0]  ;;  %v1100_v37 = vld [vmem:[%s1374_s1 + $0x70] sm:$0xff]  ;;  %v1099_v40 = vld [vmem:[%s1374_s1 + $0x68] sm:$0xff] }
  0x17   : > { %v1124_v38 = vld [vmem:[%s1374_s1 + $0x130] sm:$0xff]  ;;  %v839_v39 = vor.u32 %v1067_v35, %v836_v36  ;;  %v1123_v41 = vld [vmem:[%s1374_s1 + $0x128] sm:$0xff]  ;;  %v1098_v42 = vld [vmem:[%s1374_s1 + $0x60] sm:$0xff] }
  0x18   : > { %1129 = vmatpush.bf16.msra.mxu1 %v1090_v9  ;;  %601 = vmatpush.bf16.msra.mxu0 %v1090_v9  ;;  %v1122_v43 = vld [vmem:[%s1374_s1 + $0x120] sm:$0xff]  ;;  %v886_v44 = vld [vmem:[%s1245_s26 + $0x78] sm:$0xf]  ;;  %v1083_v45 = vld [vmem:[%s1245_s26 + $0x88] sm:$0xf0] }
  0x19   : > { %659 = vmatpush.bf16.msra.mxu2 %v1106_v10  ;;  %v846_v46 = vld [vmem:[%s1245_s26 + $0x28] sm:$0xf]  ;;  %v1073_v47 = vld [vmem:[%s1245_s26 + $0x38] sm:$0xf0]  ;;  %v854_v49 = vld [vmem:[%s1245_s26 + $0x30] sm:$0xf]  ;;  %v887_v52 = vor.u32 %v1083_v45, %v886_v44 }
  0x1a   : > { %688 = vmatpush.bf16.msra.mxu3 %v1114_v11  ;;  %v1097_v48 = vld [vmem:[%s1374_s1 + $0x58] sm:$0xff]  ;;  %v1074_v50 = vld [vmem:[%s1245_s26 + $0x40] sm:$0xf0]  ;;  %v847_v53 = vor.u32 %v1073_v47, %v846_v46  ;;  %v1072_v55 = vld [vmem:[%s1245_s26 + $0x34] sm:$0xf] }
  0x1b   : > { %v1121_v51 = vld [vmem:[%s1374_s1 + $0x118] sm:$0xff]  ;;  %v855_v54 = vor.u32 %v1074_v50, %v854_v49  ;;  %v856_v56 = vld [vmem:[%s1245_s26 + $0x44] sm:$0xf0]  ;;  %v1096_v57 = vld [vmem:[%s1374_s1 + $0x50] sm:$0xff] }
  0x1c   : > { %1130 = vmatpush.bf16.msra.mxu1 %v1089_v12  ;;  %602 = vmatpush.bf16.msra.mxu0 %v1089_v12  ;;  %v1120_v58 = vld [vmem:[%s1374_s1 + $0x110] sm:$0xff]  ;;  %v859_v59 = vor.u32 %v1072_v55, %v856_v56  ;;  %v1095_v60 = vld [vmem:[%s1374_s1 + $0x48] sm:$0xff]  ;;  %v1094_v62 = vld [vmem:[%s1374_s1 + $0x40] sm:$0xff] }
  0x1d   : > { %660 = vmatpush.bf16.msra.mxu2 %v1105_v13  ;;  %v1119_v61 = vld [vmem:[%s1374_s1 + $0x108] sm:$0xff]  ;;  %v1118_v63 = vld [vmem:[%s1374_s1 + $0x100] sm:$0xff]  ;;  %v828_v1 = vld [vmem:[%s1245_s26 + $0x14] sm:$0xf0] }
  0x1e   : > { %689 = vmatpush.bf16.msra.mxu3 %v1113_v14  ;;  %v1066_v0 = vld [vmem:[%s1245_s26 + $0x4] sm:$0xf]  ;;  %v842_v2 = vld [vmem:[%s1245_s26 + $0x10] sm:$0xf]  ;;  %v874_v4 = vld [vmem:[%s1245_s26 + $0x58] sm:$0xf] }
  0x1f   : > { %v1070_v3 = vld [vmem:[%s1245_s26 + $0x20] sm:$0xf0]  ;;  %v1079_v5 = vld [vmem:[%s1245_s26 + $0x68] sm:$0xf0]  ;;  %v831_v6 = vor.u32 %v1066_v0, %v828_v1  ;;  %v1077_v9 = vld [vmem:[%s1245_s26 + $0x5c] sm:$0xf] }
  0x20   : > { %1131 = vmatpush.bf16.msra.mxu1 %v1088_v15  ;;  %603 = vmatpush.bf16.msra.mxu0 %v1088_v15  ;;  %v843_v7 = vor.u32 %v1070_v3, %v842_v2  ;;  %v875_v8 = vor.u32 %v1079_v5, %v874_v4  ;;  %v876_v10 = vld [vmem:[%s1245_s26 + $0x6c] sm:$0xf0]  ;;  %v1071_v12 = vld [vmem:[%s1245_s26 + $0x2c] sm:$0xf]  ;;  %v848_v13 = vld [vmem:[%s1245_s26 + $0x3c] sm:$0xf0] }
  0x21   : > { %661 = vmatpush.bf16.msra.mxu2 %v1104_v16  ;;  %v879_v11 = vor.u32 %v1077_v9, %v876_v10  ;;  %v862_v14 = vld [vmem:[%s1245_s26 + $0x38] sm:$0xf]  ;;  %v1075_v15 = vld [vmem:[%s1245_s26 + $0x48] sm:$0xf0]  ;;  %v894_v16 = vld [vmem:[%s1245_s26 + $0x80] sm:$0xf] }
  0x22   : > { %690 = vmatpush.bf16.msra.mxu3 %v1112_v17  ;;  %v1084_v17 = vld [vmem:[%s1245_s26 + $0x90] sm:$0xf0]  ;;  %v1082_v21 = vld [vmem:[%s1245_s26 + $0x84] sm:$0xf]  ;;  %v868_v25 = vld [vmem:[%s1245_s26 + $0x64] sm:$0xf0] }
  0x23   : > { %v1076_v24 = vld [vmem:[%s1245_s26 + $0x54] sm:$0xf]  ;;  %v882_v26 = vld [vmem:[%s1245_s26 + $0x60] sm:$0xf]  ;;  %v902_v28 = vld [vmem:[%s1245_s26 + $0x88] sm:$0xf] }
  0x24   : > { %1132 = vmatpush.bf16.msra.mxu1 %v1087_v18  ;;  %604 = vmatpush.bf16.msra.mxu0 %v1087_v18  ;;  %v851_v18 = vor.u32 %v1071_v12, %v848_v13  ;;  %v1085_v29 = vld [vmem:[%s1245_s26 + $0x98] sm:$0xf0] }
  0x25   : > { %662 = vmatpush.bf16.msra.mxu2 %v1103_v19  ;;  %v863_v19 = vor.u32 %v1075_v15, %v862_v14 }
  0x26   : > { %691 = vmatpush.bf16.msra.mxu3 %v1111_v23 }
  0x28   : > { %1133 = vmatpush.bf16.msra.mxu1 %v1086_v20  ;;  %605 = vmatpush.bf16.msra.mxu0 %v1086_v20  ;;  %v895_v20 = vor.u32 %v1084_v17, %v894_v16 }
  0x29   : > { %663 = vmatpush.bf16.msra.mxu2 %v1102_v27  ;;  %v1080_v27 = vld [vmem:[%s1245_s26 + $0x70] sm:$0xf0] }
  0x2a   : > { %692 = vmatpush.bf16.msra.mxu3 %v1110_v34  ;;  %v888_v34 = vld [vmem:[%s1245_s26 + $0x8c] sm:$0xf0] }
  0x2b   : > { %616 = vmatmul.bf16.vlgmr.msra.gmra.mxu1 %v867_v31  ;;  %606 = vmatmul.bf16.vlgmr.msra.gmra.mxu0 %v827_v32  ;;  %v883_v31 = vor.u32 %v1080_v27, %v882_v26  ;;  %v903_v32 = vor.u32 %v1085_v29, %v902_v28 }
  0x2c   : > { %627 = vmatpush.bf16.msrb.mxu1 %v1101_v22  ;;  %714 = vmatpush.bf16.msrb.mxu0 %v1125_v30  ;;  %v896_v22 = vld [vmem:[%s1245_s26 + $0x94] sm:$0xf0] }
  0x2d   : > { %1134 = vmatpush.bf16.msrb.mxu2 %v1125_v30  ;;  %693 = vmatmul.bf16.vlgmr.msra.gmra.mxu3 %v839_v39  ;;  %v899_v23 = vor.u32 %v1082_v21, %v896_v22  ;;  %v871_v30 = vor.u32 %v1076_v24, %v868_v25 }
  0x2e   : > { %664 = vmatmul.bf16.vlgmr.msra.gmra.mxu2 %v835_v33  ;;  %v1081_v33 = vld [vmem:[%s1245_s26 + $0x7c] sm:$0xf]  ;;  %s823_s26 = sshll.u32 %s1377_s27, 3 }
  0x2f   : > { %v891_v35 = vor.u32 %v1081_v33, %v888_v34  ;;  %s1358_s20 = scalar_lea.vmem %s1375_s2, %s823_s26 }
  0x30   : > { %628 = vmatpush.bf16.msrb.mxu1 %v1100_v37  ;;  %715 = vmatpush.bf16.msrb.mxu0 %v1124_v38 }
  0x31   : > { %1135 = vmatpush.bf16.msrb.mxu2 %v1124_v38 }
  0x34   : > { %629 = vmatpush.bf16.msrb.mxu1 %v1099_v40  ;;  %716 = vmatpush.bf16.msrb.mxu0 %v1123_v41 }
  0x35   : > { %1136 = vmatpush.bf16.msrb.mxu2 %v1123_v41 }
  0x38   : > { %630 = vmatpush.bf16.msrb.mxu1 %v1098_v42  ;;  %717 = vmatpush.bf16.msrb.mxu0 %v1122_v43 }
  0x39   : > { %1137 = vmatpush.bf16.msrb.mxu2 %v1122_v43 }
  0x3b   : > { %621 = vmatmul.bf16.gmra.mxu1 %v887_v52  ;;  %611 = vmatmul.bf16.gmra.mxu0 %v847_v53 }
  0x3c   : > { %631 = vmatpush.bf16.msrb.mxu1 %v1097_v48  ;;  %718 = vmatpush.bf16.msrb.mxu0 %v1121_v51 }
  0x3d   : > { %1138 = vmatpush.bf16.msrb.mxu2 %v1121_v51  ;;  %698 = vmatmul.bf16.gmra.mxu3 %v859_v59 }
  0x3e   : > { %669 = vmatmul.bf16.gmra.mxu2 %v855_v54 }
  0x40   : > { %632 = vmatpush.bf16.msrb.mxu1 %v1096_v57  ;;  %719 = vmatpush.bf16.msrb.mxu0 %v1120_v58 }
  0x41   : > { %1139 = vmatpush.bf16.msrb.mxu2 %v1120_v58 }
  0x44   : > { %633 = vmatpush.bf16.msrb.mxu1 %v1095_v60  ;;  %720 = vmatpush.bf16.msrb.mxu0 %v1119_v61 }
  0x45   : > { %1140 = vmatpush.bf16.msrb.mxu2 %v1119_v61 }
  0x48   : > { %634 = vmatpush.bf16.msrb.mxu1 %v1094_v62  ;;  %721 = vmatpush.bf16.msrb.mxu0 %v1118_v63 }
  0x49   : > { %1141 = vmatpush.bf16.msrb.mxu2 %v1118_v63 }
  0x4b   : > { %635 = vmatmul.bf16.vlgmr.msrb.gmra.mxu1 %v831_v6  ;;  %722 = vmatmul.bf16.vlgmr.msrb.gmra.mxu0 %v843_v7 }
  0x4d   : > { %703 = vmatmul.bf16.gmra.mxu3 %v879_v11 }
  0x4e   : > { %674 = vmatmul.bf16.gmra.mxu2 %v875_v8 }
  0x5b   : > { %640 = vmatmul.bf16.gmra.mxu1 %v851_v18  ;;  %727 = vmatmul.bf16.gmra.mxu0 %v863_v19 }
  0x5d   : > { %708 = vmatmul.bf16.gmra.mxu3 %v899_v23 }
  0x5e   : > { %679 = vmatmul.bf16.gmra.mxu2 %v895_v20 }
  0x6b   : > { %645 = vmatmul.bf16.gmra.mxu1 %v871_v30  ;;  %732 = vmatmul.bf16.gmra.mxu0 %v883_v31 }
  0x6e   : > { %737 = vmatmul.bf16.vlgmr.msrb.gmra.mxu2 %v903_v32 }
  0x7b   : > { %650 = vmatmul.bf16.gmra.mxu1 %v891_v35 }
  0xa8   : > { %v617_v36 = vpop.f32.mrf.mxu1  ;;  %v607_v37 = vpop.f32.mrf.mxu0 }
  0xb0   : > { %v619_v39 = vpop.f32.mrf.mxu1  ;;  %v609_v40 = vpop.f32.mrf.mxu0 }
  0xb1   : > { %v665_v38 = vpop.f32.mrf.mxu2  ;;  %v694_v44 = vpop.f32.mrf.mxu3 }
  0xb8   : > { %v1350_v42 = vpop.f32.mrf.mxu1  ;;  %v612_v43 = vpop.f32.mrf.mxu0 }
  0xb9   : > { %v667_v41 = vpop.f32.mrf.mxu2  ;;  %v696_v48 = vpop.f32.mrf.mxu3 }
  0xc0   : > { %v1352_v46 = vpop.f32.mrf.mxu1  ;;  %v614_v47 = vpop.f32.mrf.mxu0 }
  0xc1   : > { %v670_v45 = vpop.f32.mrf.mxu2  ;;  %v699_v60 = vpop.f32.mrf.mxu3 }
  0xc8   : > { %v636_v49 = vpop.f32.mrf.mxu1  ;;  %v723_v50 = vpop.f32.mrf.mxu0 }
  0xc9   : > { %v637_v51 = vadd.f32 %v636_v49, %v607_v37  ;;  %v672_v52 = vpop.f32.mrf.mxu2  ;;  %v701_v6 = vpop.f32.mrf.mxu3 }
  0xcb   : > { %v666_v53 = vadd.f32 %v665_v38, %v637_v51 }
  0xcd   : > { %v695_v54 = vadd.f32 %v694_v44, %v666_v53 }
  0xcf   : > { %v724_v55 = vadd.f32 %v723_v50, %v695_v54 }
  0xd0   : > { %v638_v56 = vpop.f32.mrf.mxu1  ;;  %v725_v57 = vpop.f32.mrf.mxu0 }
  0xd1   : > { %v743_v58 = vmax.f32 %v724_v55, 0.0  ;;  %v639_v59 = vadd.f32 %v638_v56, %v609_v40  ;;  %v675_v62 = vpop.f32.mrf.mxu2  ;;  %v704_v16 = vpop.f32.mrf.mxu3 }
  0xd3   : > { %751 = vst [vmem:[%s1358_s20] sm:$0xff] %v743_v58  ;;  %v668_v61 = vadd.f32 %v667_v41, %v639_v59 }
  0xd5   : > { %v697_v63 = vadd.f32 %v696_v48, %v668_v61 }
  0xd7   : > { %v726_v0 = vadd.f32 %v725_v57, %v697_v63 }
  0xd8   : > { %v641_v1 = vpop.f32.mrf.mxu1  ;;  %v728_v2 = vpop.f32.mrf.mxu0 }
  0xd9   : > { %v744_v3 = vmax.f32 %v726_v0, 0.0  ;;  %v642_v4 = vadd.f32 %v641_v1, %v612_v43  ;;  %v677_v8 = vpop.f32.mrf.mxu2  ;;  %v706_v26 = vpop.f32.mrf.mxu3 }
  0xdb   : > { %752 = vst [vmem:[%s1358_s20 + $0x8] sm:$0xff] %v744_v3  ;;  %v671_v5 = vadd.f32 %v670_v45, %v642_v4 }
  0xdd   : > { %v700_v7 = vadd.f32 %v699_v60, %v671_v5 }
  0xdf   : > { %v729_v9 = vadd.f32 %v728_v2, %v700_v7 }
  0xe0   : > { %v643_v10 = vpop.f32.mrf.mxu1  ;;  %v730_v11 = vpop.f32.mrf.mxu0 }
  0xe1   : > { %v745_v12 = vmax.f32 %v729_v9, 0.0  ;;  %v644_v13 = vadd.f32 %v643_v10, %v614_v47  ;;  %v680_v18 = vpop.f32.mrf.mxu2  ;;  %v709_v38 = vpop.f32.mrf.mxu3 }
  0xe3   : > { %753 = vst [vmem:[%s1358_s20 + $0x10] sm:$0xff] %v745_v12  ;;  %v673_v14 = vadd.f32 %v672_v52, %v644_v13 }
  0xe5   : > { %v702_v15 = vadd.f32 %v701_v6, %v673_v14 }
  0xe7   : > { %v731_v17 = vadd.f32 %v730_v11, %v702_v15 }
  0xe8   : > { %v646_v19 = vpop.f32.mrf.mxu1  ;;  %v733_v22 = vpop.f32.mrf.mxu0 }
  0xe9   : > { %v746_v20 = vmax.f32 %v731_v17, 0.0  ;;  %v647_v21 = vadd.f32 %v646_v19, %v617_v36  ;;  %v682_v30 = vpop.f32.mrf.mxu2  ;;  %v711_v49 = vpop.f32.mrf.mxu3 }
  0xeb   : > { %754 = vst [vmem:[%s1358_s20 + $0x18] sm:$0xff] %v746_v20  ;;  %v676_v23 = vadd.f32 %v675_v62, %v647_v21 }
  0xed   : > { %v705_v24 = vadd.f32 %v704_v16, %v676_v23 }
  0xef   : > { %v734_v25 = vadd.f32 %v733_v22, %v705_v24 }
  0xf0   : > { %v648_v27 = vpop.f32.mrf.mxu1  ;;  %v735_v32 = vpop.f32.mrf.mxu0 }
  0xf1   : > { %v747_v28 = vmax.f32 %v734_v25, 0.0  ;;  %v649_v29 = vadd.f32 %v648_v27, %v619_v39  ;;  %v738_v41 = vpop.f32.mrf.mxu2 }
  0xf3   : > { %755 = vst [vmem:[%s1358_s20 + $0x20] sm:$0xff] %v747_v28  ;;  %v678_v31 = vadd.f32 %v677_v8, %v649_v29 }
  0xf5   : > { %v707_v33 = vadd.f32 %v706_v26, %v678_v31 }
  0xf7   : > { %v736_v34 = vadd.f32 %v735_v32, %v707_v33 }
  0xf8   : > { %v651_v35 = vpop.f32.mrf.mxu1 }
  0xf9   : > { %v748_v37 = vmax.f32 %v736_v34, 0.0  ;;  %v652_v36 = vadd.f32 %v651_v35, %v1350_v42  ;;  %v740_v51 = vpop.f32.mrf.mxu2 }
  0xfb   : > { %756 = vst [vmem:[%s1358_s20 + $0x28] sm:$0xff] %v748_v37  ;;  %v681_v40 = vadd.f32 %v680_v18, %v652_v36 }
  0xfd   : > { %v710_v43 = vadd.f32 %v709_v38, %v681_v40 }
  0xff   : > { %v739_v44 = vadd.f32 %v738_v41, %v710_v43 }
 0x100   : > { %v653_v45 = vpop.f32.mrf.mxu1 }
 0x101   : > { %v749_v39 = vmax.f32 %v739_v44, 0.0  ;;  %v654_v47 = vadd.f32 %v653_v45, %v1352_v46 }
 0x103   : > { %757 = vst [vmem:[%s1358_s20 + $0x30] sm:$0xff] %v749_v39  ;;  %v683_v48 = vadd.f32 %v682_v30, %v654_v47 }
 0x105   : > { %v712_v50 = vadd.f32 %v711_v49, %v683_v48 }
 0x107   : > { %v741_v52 = vadd.f32 %v740_v51, %v712_v50 }
 0x109   : > { %v750_v53 = vmax.f32 %v741_v52, 0.0 }
 0x10b   : > { %758 = vst [vmem:[%s1358_s20 + $0x38] sm:$0xff] %v750_v53 }
 0x10c PF: > { %s12_s9 = sadd.s32 1, %s1157_s9  }
 0x10d   : > { %p9_p4 = scmp.ge.s32.totalorder %s12_s9, 4  }
 0x10f   :  { %11 = sbr.rel (!%p9_p4) target bundleno = 1 (0x1), region = 58 }

// kernel: autoencoder_forward.6
= control target key start
LH: loop header
LB: loop body
LE: loop exit
PB: predicated region body
PF: predicated region fallthrough
CT: control target
= control target key end

     0   :  { %s642_s9 = smov 0   ;;  %s735_s0 = inlined_call_operand.vmem [shape: bf16[32,384], index: 0, kind: input, shape index: {}]   ;;  %s736_s1 = inlined_call_operand.vmem [shape: bf16[384,128], index: 1, kind: input, shape index: {}]   ;;  %s737_s2 = inlined_call_operand.vmem [shape: f32[32,128], index: 2, kind: output, shape index: {}]  }
   0x1 LB: > { %s464_s10 = sadd.s32 4294967295, %s625_s9   ;;  %p468_p0 = scmp.ge.s32.totalorder %s625_s9, 1  ;;  %s625_s9 = sphi %s642_s9, %s12_s9  }
   0x2   : > { %p114_p1 = scmp.lt.s32.totalorder %s625_s9, 3 }
   0x4   : > { %p115_p2 = pnand %p468_p0, %p114_p1 }
   0x5   : > { %s469_s29 = sshll.u32 (!%p115_p2), %s464_s10, 1 }
   0x6   : > { %118 = sbr.rel (%p115_p2) target bundleno = 190 (0xbe), region = 28  ;;  %p138_p3 = scmp.lt.s32.totalorder (!%p115_p2), %s469_s29, 3 }
   0xb   : > { %v593_v0 = vld [vmem:[%s736_s1 + $0x38] sm:$0xff]  ;;  %v592_v3 = vld [vmem:[%s736_s1 + $0x30] sm:$0xff]  ;;  %v591_v6 = vld [vmem:[%s736_s1 + $0x28] sm:$0xff]  ;;  %s739_s29 = smov (!%p138_p3, %s469_s29), 3 }
   0xc   : > { %v601_v1 = vld [vmem:[%s736_s1 + $0x78] sm:$0xff]  ;;  %362 = vmatpush.bf16.msra.mxu0 %v593_v0  ;;  %v600_v4 = vld [vmem:[%s736_s1 + $0x70] sm:$0xff]  ;;  %v599_v7 = vld [vmem:[%s736_s1 + $0x68] sm:$0xff]  ;;  %s610_s19 = smul.u32 12, %s739_s29  ;;  %s472_s11 = sshll.u32 %s739_s29, 3 }
   0xd   : > { %v609_v2 = vld [vmem:[%s736_s1 + $0xb8] sm:$0xff]  ;;  %376 = vmatpush.bf16.msra.mxu1 %v601_v1  ;;  %v608_v5 = vld [vmem:[%s736_s1 + $0xb0] sm:$0xff]  ;;  %v607_v8 = vld [vmem:[%s736_s1 + $0xa8] sm:$0xff]  ;;  %s148_s14 = scalar_lea.vmem %s737_s2, %s472_s11 }
   0xe   : > { %390 = vmatpush.bf16.msra.mxu2 %v609_v2  ;;  %v590_v9 = vld [vmem:[%s736_s1 + $0x20] sm:$0xff]  ;;  %v589_v12 = vld [vmem:[%s736_s1 + $0x18] sm:$0xff]  ;;  %v588_v15 = vld [vmem:[%s736_s1 + $0x10] sm:$0xff]  ;;  %s142_s28 = scalar_lea.vmem %s735_s0, %s610_s19 }
   0xf   : > { %v598_v10 = vld [vmem:[%s736_s1 + $0x60] sm:$0xff]  ;;  %v597_v13 = vld [vmem:[%s736_s1 + $0x58] sm:$0xff]  ;;  %v596_v16 = vld [vmem:[%s736_s1 + $0x50] sm:$0xff] }
  0x10   : > { %363 = vmatpush.bf16.msra.mxu0 %v592_v3  ;;  %v606_v11 = vld [vmem:[%s736_s1 + $0xa0] sm:$0xff]  ;;  %v605_v14 = vld [vmem:[%s736_s1 + $0x98] sm:$0xff]  ;;  %v604_v17 = vld [vmem:[%s736_s1 + $0x90] sm:$0xff] }
  0x11   : > { %377 = vmatpush.bf16.msra.mxu1 %v600_v4  ;;  %v587_v18 = vld [vmem:[%s736_s1 + $0x8] sm:$0xff]  ;;  %v586_v21 = vld [vmem:[%s736_s1] sm:$0xff]  ;;  %v477_v26 = vld [vmem:[%s142_s28 + $0xc] sm:$0xf0] }
  0x12   : > { %391 = vmatpush.bf16.msra.mxu2 %v608_v5  ;;  %v595_v19 = vld [vmem:[%s736_s1 + $0x48] sm:$0xff]  ;;  %v594_v22 = vld [vmem:[%s736_s1 + $0x40] sm:$0xff]  ;;  %v585_v29 = vld [vmem:[%s142_s28 + $0x10] sm:$0xf0] }
  0x13   : > { %v603_v20 = vld [vmem:[%s736_s1 + $0x88] sm:$0xff]  ;;  %v475_v23 = vld [vmem:[%s142_s28] sm:$0xf]  ;;  %v583_v25 = vld [vmem:[%s142_s28 + $0x4] sm:$0xf] }
  0x14   : > { %364 = vmatpush.bf16.msra.mxu0 %v591_v6  ;;  %v584_v24 = vld [vmem:[%s142_s28 + $0x8] sm:$0xf0]  ;;  %v602_v27 = vld [vmem:[%s736_s1 + $0x80] sm:$0xff]  ;;  %v483_v28 = vld [vmem:[%s142_s28 + $0x8] sm:$0xf]  ;;  %v480_v31 = vor.u32 %v583_v25, %v477_v26 }
  0x15   : > { %378 = vmatpush.bf16.msra.mxu1 %v599_v7  ;;  %v476_v30 = vor.u32 %v584_v24, %v475_v23  ;;  %v484_v32 = vor.u32 %v585_v29, %v483_v28 }
  0x16   : > { %392 = vmatpush.bf16.msra.mxu2 %v607_v8 }
  0x18   : > { %365 = vmatpush.bf16.msra.mxu0 %v590_v9 }
  0x19   : > { %379 = vmatpush.bf16.msra.mxu1 %v598_v10 }
  0x1a   : > { %393 = vmatpush.bf16.msra.mxu2 %v606_v11 }
  0x1c   : > { %366 = vmatpush.bf16.msra.mxu0 %v589_v12 }
  0x1d   : > { %380 = vmatpush.bf16.msra.mxu1 %v597_v13 }
  0x1e   : > { %394 = vmatpush.bf16.msra.mxu2 %v605_v14 }
  0x20   : > { %367 = vmatpush.bf16.msra.mxu0 %v588_v15 }
  0x21   : > { %381 = vmatpush.bf16.msra.mxu1 %v596_v16 }
  0x22   : > { %395 = vmatpush.bf16.msra.mxu2 %v604_v17 }
  0x24   : > { %368 = vmatpush.bf16.msra.mxu0 %v587_v18 }
  0x25   : > { %382 = vmatpush.bf16.msra.mxu1 %v595_v19 }
  0x26   : > { %396 = vmatpush.bf16.msra.mxu2 %v603_v20 }
  0x28   : > { %369 = vmatpush.bf16.msra.mxu0 %v586_v21 }
  0x29   : > { %383 = vmatpush.bf16.msra.mxu1 %v594_v22 }
  0x2a   : > { %397 = vmatpush.bf16.msra.mxu2 %v602_v27 }
  0x2b   : > { %370 = vmatmul.bf16.vlgmr.msra.gmra.mxu0 %v476_v30 }
  0x2c   : > { %384 = vmatmul.bf16.vlgmr.msra.gmra.mxu1 %v480_v31 }
  0x2d   : > { %398 = vmatmul.bf16.vlgmr.msra.gmra.mxu2 %v484_v32 }
  0xa8   : > { %v371_v33 = vpop.f32.mrf.mxu0 }
  0xa9   : > { %v385_v34 = vpop.f32.mrf.mxu1 }
  0xaa   : > { %v386_v35 = vadd.f32 %v385_v34, %v371_v33 }
  0xb0   : > { %v399_v36 = vpop.f32.mrf.mxu2  ;;  %v373_v39 = vpop.f32.mrf.mxu0 }
  0xb1   : > { %v400_v37 = vadd.f32 %v399_v36, %v386_v35  ;;  %v387_v40 = vpop.f32.mrf.mxu1 }
  0xb2   : > { %v388_v41 = vadd.f32 %v387_v40, %v373_v39 }
  0xb3   : > { %v404_v38 = vmax.f32 %v400_v37, 0.0 }
  0xb5   : > { %406 = vst [vmem:[%s148_s14] sm:$0xff] %v404_v38 }
  0xb8   : > { %v401_v42 = vpop.f32.mrf.mxu2 }
  0xb9   : > { %v402_v43 = vadd.f32 %v401_v42, %v388_v41 }
  0xbb   : > { %v405_v44 = vmax.f32 %v402_v43, 0.0 }
  0xbd   : > { %407 = vst [vmem:[%s148_s14 + $0x8] sm:$0xff] %v405_v44 }
  0xbe PF: > { %s12_s9 = sadd.s32 1, %s625_s9  }
  0xbf   : > { %p9_p4 = scmp.ge.s32.totalorder %s12_s9, 4  }
  0xc1   :  { %11 = sbr.rel (!%p9_p4) target bundleno = 1 (0x1), region = 58 }

// kernel: autoencoder_forward.7
= control target key start
LH: loop header
LB: loop body
LE: loop exit
PB: predicated region body
PF: predicated region fallthrough
CT: control target
= control target key end

     0   :  { %s358_s1 = inlined_call_operand.vmem [shape: bf16[256,128], index: 1, kind: input, shape index: {}]   ;;  %s359_s0 = inlined_call_operand.vmem [shape: bf16[16,256], index: 0, kind: input, shape index: {}]   ;;  %s360_s2 = inlined_call_operand.vmem [shape: f32[16,128], index: 2, kind: output, shape index: {}]  }
   0x1   :  { %v268_v0 = vld [vmem:[%s358_s1 + $0x38] sm:$0xff]  ;;  %v267_v2 = vld [vmem:[%s358_s1 + $0x30] sm:$0xff]  ;;  %v266_v4 = vld [vmem:[%s358_s1 + $0x28] sm:$0xff] }
   0x2   :  { %v276_v1 = vld [vmem:[%s358_s1 + $0x78] sm:$0xff]  ;;  %151 = vmatpush.bf16.msra.mxu0 %v268_v0  ;;  %v275_v3 = vld [vmem:[%s358_s1 + $0x70] sm:$0xff]  ;;  %v274_v5 = vld [vmem:[%s358_s1 + $0x68] sm:$0xff] }
   0x3   :  { %165 = vmatpush.bf16.msra.mxu1 %v276_v1  ;;  %v265_v6 = vld [vmem:[%s358_s1 + $0x20] sm:$0xff]  ;;  %v264_v8 = vld [vmem:[%s358_s1 + $0x18] sm:$0xff]  ;;  %v263_v10 = vld [vmem:[%s358_s1 + $0x10] sm:$0xff] }
   0x4   :  { %v273_v7 = vld [vmem:[%s358_s1 + $0x60] sm:$0xff]  ;;  %v272_v9 = vld [vmem:[%s358_s1 + $0x58] sm:$0xff]  ;;  %v271_v11 = vld [vmem:[%s358_s1 + $0x50] sm:$0xff] }
   0x5   :  { %v262_v12 = vld [vmem:[%s358_s1 + $0x8] sm:$0xff]  ;;  %v261_v14 = vld [vmem:[%s358_s1] sm:$0xff] }
   0x6   :  { %152 = vmatpush.bf16.msra.mxu0 %v267_v2  ;;  %v270_v13 = vld [vmem:[%s358_s1 + $0x48] sm:$0xff]  ;;  %v269_v15 = vld [vmem:[%s358_s1 + $0x40] sm:$0xff] }
   0x7   :  { %166 = vmatpush.bf16.msra.mxu1 %v275_v3  ;;  %v189_v16 = vld [vmem:[%s359_s0] sm:$0xf]  ;;  %v260_v17 = vld [vmem:[%s359_s0 + $0x4] sm:$0xf0]  ;;  %v259_v18 = vld [vmem:[%s359_s0 + $0x4] sm:$0xf] }
   0x8   :  { %v191_v19 = vld [vmem:[%s359_s0 + $0x8] sm:$0xf0]  ;;  %v190_v20 = vor.u32 %v260_v17, %v189_v16 }
   0x9   :  { %v194_v21 = vor.u32 %v259_v18, %v191_v19 }
   0xa   :  { %153 = vmatpush.bf16.msra.mxu0 %v266_v4 }
   0xb   :  { %167 = vmatpush.bf16.msra.mxu1 %v274_v5 }
   0xe   :  { %154 = vmatpush.bf16.msra.mxu0 %v265_v6 }
   0xf   :  { %168 = vmatpush.bf16.msra.mxu1 %v273_v7 }
  0x12   :  { %155 = vmatpush.bf16.msra.mxu0 %v264_v8 }
  0x13   :  { %169 = vmatpush.bf16.msra.mxu1 %v272_v9 }
  0x16   :  { %156 = vmatpush.bf16.msra.mxu0 %v263_v10 }
  0x17   :  { %170 = vmatpush.bf16.msra.mxu1 %v271_v11 }
  0x1a   :  { %157 = vmatpush.bf16.msra.mxu0 %v262_v12 }
  0x1b   :  { %171 = vmatpush.bf16.msra.mxu1 %v270_v13 }
  0x1e   :  { %158 = vmatpush.bf16.msra.mxu0 %v261_v14 }
  0x1f   :  { %172 = vmatpush.bf16.msra.mxu1 %v269_v15 }
  0x21   :  { %159 = vmatmul.bf16.vlgmr.msra.gmra.mxu0 %v190_v20 }
  0x22   :  { %173 = vmatmul.bf16.vlgmr.msra.gmra.mxu1 %v194_v21 }
  0x9e   :  { %v160_v22 = vpop.f32.mrf.mxu0 }
  0x9f   :  { %v174_v23 = vpop.f32.mrf.mxu1 }
  0xa0   :  { %v175_v24 = vadd.f32 %v174_v23, %v160_v22 }
  0xa2   :  { %v179_v25 = vmax.f32 %v175_v24, 0.0 }
  0xa4   :  { %181 = vst [vmem:[%s360_s2] sm:$0xff] %v179_v25 }
  0xa6   :  { %v162_v26 = vpop.f32.mrf.mxu0 }
  0xa7   :  { %v176_v27 = vpop.f32.mrf.mxu1 }
  0xa8   :  { %v177_v28 = vadd.f32 %v176_v27, %v162_v26 }
  0xaa   :  { %v180_v29 = vmax.f32 %v177_v28, 0.0 }
  0xac   :  { %182 = vst [vmem:[%s360_s2 + $0x8] sm:$0xff] %v180_v29 }

</bundles_post_ra>
